<compile_context>
chip_gen: v5e
topology: v5e:2x2
jax: 0.10.0
libtpu: 0.0.40
codegen_flags: <defaults>
</compile_context>

<pallas_src>
import jax
import jax.numpy as jnp
from jax import lax
from jax.experimental import pallas as pl
from jax.experimental.pallas import tpu as pltpu


def fold_params(emb_table, fc_w, fc_b, *, seq_len):
    """One-time parameter fold. Returns the interleaved (2V, 2) f32 lookup table.

    Row 2v   = emb[v] @ W1 / L + bias/(2L)   (sentence-1 contribution)
    Row 2v+1 = emb[v] @ W2 / L + bias/(2L)   (sentence-2 contribution)
    Cache the result across forward calls; only the fused kernel runs per step.
    """
    V, E = emb_table.shape
    w_cat = jnp.concatenate(
        [jnp.transpose(fc_w[:, :E]), jnp.transpose(fc_w[:, E:])], axis=1
    ).astype(jnp.float32)                                              # (E, 4) = [W1 | W2]
    tbl = jnp.dot(emb_table.astype(jnp.float32), w_cat,
                  precision=jax.lax.Precision.HIGHEST)                 # (V, 4), one emb read
    tbl = tbl / seq_len + jnp.tile(fc_b.astype(jnp.float32), 2) / (2.0 * seq_len)
    return tbl.reshape(2 * V, 2)                                       # interleaved rows


def abcnn_forward(inputs, table, *, tile_b=256):
    """inputs: (B, 2, L) int token ids;  table: (2V, 2) f32 from fold_params.
       returns (B, 2) f32 logits."""
    B, two, L = inputs.shape
    assert two == 2
    two_v, _ = table.shape
    V = two_v // 2

    # ids as a normal VMEM-tiled input, sentence axis flattened for lane density.
    ids = inputs.reshape(B, 2 * L).astype(jnp.int32)

    TB = min(tile_b, B)
    # v7x megacore: ensure the "parallel" batch axis has >= 2 grid steps.
    if B >= 16 and pl.cdiv(B, TB) < 2:
        TB = ((pl.cdiv(B, 2) + 7) // 8) * 8
    grid = (pl.cdiv(B, TB),)

    def kernel(ids_ref, tbl_ref, out_ref):
        # ids_ref: VMEM (TB, 2L) int32   tbl_ref: VMEM (2V, 2) f32 (resident)
        ids_blk = ids_ref[...]                                          # (TB, 2L)
        pos = lax.broadcasted_iota(jnp.int32, ids_blk.shape, 1)
        # Interleaved table-row index: 2*id for sentence 1, 2*id + 1 for sentence 2.
        rows = ids_blk * 2 + jnp.where(pos >= L, 1, 0)                  # (TB, 2L)
        vocab = lax.broadcasted_iota(jnp.int32, (TB, 2 * L, 2 * V), 2)
        onehot = (rows[:, :, None] == vocab).astype(jnp.float32)        # (TB, 2L, 2V)
        counts = jnp.sum(onehot, axis=1)                                # (TB, 2V)
        out_ref[...] = jnp.dot(counts, tbl_ref[...],
                               precision=jax.lax.Precision.HIGHEST,
                               preferred_element_type=jnp.float32)      # (TB, 2)

    return pl.pallas_call(
        kernel,
        out_shape=jax.ShapeDtypeStruct((B, 2), jnp.float32),
        grid=grid,
        in_specs=[
            pl.BlockSpec((TB, 2 * L), lambda i: (i, 0)),                # ids batch tile
            pl.BlockSpec(memory_space=pltpu.MemorySpace.VMEM),          # resident folded table
        ],
        out_specs=pl.BlockSpec((TB, 2), lambda i: (i, 0)),
        compiler_params=pltpu.CompilerParams(
            dimension_semantics=("parallel",),                          # v7x: shard batch over TCs
        ),
    )(ids, table)


def reference(inputs, emb_table, fc_w, fc_b):
    """Pure-JAX reference of the exact module semantics (emb -> AllAP -> cat -> Linear)."""
    x1 = jnp.take(emb_table, inputs[:, 0, :], axis=0)
    x2 = jnp.take(emb_table, inputs[:, 1, :], axis=0)
    feats = jnp.concatenate([x1.mean(axis=1), x2.mean(axis=1)], axis=1)
    return jnp.dot(feats, fc_w.T, precision=jax.lax.Precision.HIGHEST) + fc_b


if __name__ == "__main__":
    key = jax.random.PRNGKey(0)
    k1, k2, k3, k4, k5 = jax.random.split(key, 5)

    B, L, E, V = 8, 8, 32, 64            # batch, max_length, embedding_size, vocab
    inputs = jax.random.randint(k1, (B, 2, L), 0, V, dtype=jnp.int32)
    emb_table = jax.random.normal(k2, (V, E), dtype=jnp.float32)
    fc_w = 0.1 * jax.random.normal(k3, (2, 2 * E), dtype=jnp.float32)   # final_size = 2E
    fc_b = 0.1 * jax.random.normal(k4, (2,), dtype=jnp.float32)

    # One-time parameter fold (cached across forwards); steady state runs only the kernel.
    table = fold_params(emb_table, fc_w, fc_b, seq_len=L)

    fwd = jax.jit(abcnn_forward)
    out = jax.block_until_ready(fwd(inputs, table))
    assert out.shape == (B, 2) and out.dtype == jnp.float32
    ref = reference(inputs, emb_table, fc_w, fc_b)
    assert jnp.allclose(out, ref, atol=1e-4, rtol=1e-4), (out, ref)

    # Tail-tile / multi-grid-step check: B % TB != 0 and grid >= 2.
    B2 = 20
    inputs2 = jax.random.randint(k5, (B2, 2, L), 0, V, dtype=jnp.int32)
    out2 = jax.block_until_ready(fwd(inputs2, table))
    ref2 = reference(inputs2, emb_table, fc_w, fc_b)
    assert out2.shape == (B2, 2)
    assert jnp.allclose(out2, ref2, atol=1e-4, rtol=1e-4), (out2, ref2)

    print("KERNEL_OK")
</pallas_src>

<mosaic_0001>
module attributes {stable_mosaic.version = 11 : i64} {
  func.func @kernel(%arg0: i32, %arg1: memref<8x16xi32, #tpu.memory_space<vmem>>, %arg2: memref<128x2xf32, #tpu.memory_space<vmem>>, %arg3: memref<8x2xf32, #tpu.memory_space<vmem>>) attributes {dimension_semantics = [#tpu.dimension_semantics<parallel>], iteration_bounds = array<i64: 1>, scalar_prefetch = 0 : i64, scratch_operands = 0 : i64, tpu.core_type = #tpu.core_type<tc>, window_params = [{transform_indices = @transform_0, window_bounds = array<i64: 8, 16>}, {pipeline_mode = #tpu.pipeline_mode<synchronous>, transform_indices = @transform_1, window_bounds = array<i64: 128, 2>}, {transform_indices = @transform_2, window_bounds = array<i64: 8, 2>}]} {
    %c0 = arith.constant 0 : index
    %c0_0 = arith.constant 0 : index
    %0 = vector.load %arg1[%c0, %c0_0] : memref<8x16xi32, #tpu.memory_space<vmem>>, vector<8x16xi32>
    %1 = tpu.iota {dimensions = array<i32: 1>} : vector<8x16xi32>
    %c2_i32 = arith.constant 2 : i32
    %2 = vector.broadcast %c2_i32 : i32 to vector<8x16xi32>
    %3 = arith.muli %0, %2 : vector<8x16xi32>
    %c8_i32 = arith.constant 8 : i32
    %4 = vector.broadcast %c8_i32 : i32 to vector<8x16xi32>
    %5 = arith.cmpi sge, %1, %4 : vector<8x16xi32>
    %c1_i32 = arith.constant 1 : i32
    %c0_i32 = arith.constant 0 : i32
    %6 = vector.broadcast %c1_i32 : i32 to vector<8x16xi32>
    %7 = vector.broadcast %c0_i32 : i32 to vector<8x16xi32>
    %8 = arith.select %5, %6, %7 : vector<8x16xi1>, vector<8x16xi32>
    %9 = arith.addi %3, %8 : vector<8x16xi32>
    %10 = tpu.iota {dimensions = array<i32: 2>} : vector<8x16x128xi32>
    %11 = vector.shape_cast %9 : vector<8x16xi32> to vector<8x16x1xi32>
    %12 = vector.broadcast %11 : vector<8x16x1xi32> to vector<8x16x128xi32>
    %13 = arith.cmpi eq, %12, %10 : vector<8x16x128xi32>
    %14 = arith.extui %13 : vector<8x16x128xi1> to vector<8x16x128xi32>
    %15 = arith.sitofp %14 : vector<8x16x128xi32> to vector<8x16x128xf32>
    %cst = arith.constant dense<0.000000e+00> : vector<8x128xf32>
    %16 = vector.multi_reduction <add>, %15, %cst [1] : vector<8x16x128xf32> to vector<8x128xf32>
    %c0_1 = arith.constant 0 : index
    %c0_2 = arith.constant 0 : index
    %17 = vector.load %arg2[%c0_1, %c0_2] : memref<128x2xf32, #tpu.memory_space<vmem>>, vector<128x2xf32>
    %cst_3 = arith.constant dense<0.000000e+00> : vector<8x2xf32>
    %18 = tpu.matmul %16, %17, %cst_3 {dimension_numbers = #tpu.dot_dimension_numbers<[1], [0], [0], [1], [0, 0, 1, 1], [], []>, precision = #tpu.contract_precision<fp32>} : vector<8x128xf32>, vector<128x2xf32>, vector<8x2xf32> -> vector<8x2xf32>
    %c0_4 = arith.constant 0 : index
    %c0_5 = arith.constant 0 : index
    %19 = vector.load %arg3[%c0_4, %c0_5] : memref<8x2xf32, #tpu.memory_space<vmem>>, vector<8x2xf32>
    tpu.vector_store %arg3[%c0_4, %c0_5], %18 {strides = array<i32>} : memref<8x2xf32, #tpu.memory_space<vmem>>, vector<8x2xf32>,
    return
  }
  func.func @transform_0(%arg0: i32) -> (i32, i32) {
    %c0_i32 = arith.constant 0 : i32
    %c0_i32_0 = arith.constant 0 : i32
    return %arg0, %c0_i32 : i32, i32
  }
  func.func @transform_1(%arg0: i32) -> (i32, i32) {
    %c0_i32 = arith.constant 0 : i32
    %c0_i32_0 = arith.constant 0 : i32
    %c0_i32_1 = arith.constant 0 : i32
    return %c0_i32, %c0_i32_0 : i32, i32
  }
  func.func @transform_2(%arg0: i32) -> (i32, i32) {
    %c0_i32 = arith.constant 0 : i32
    %c0_i32_0 = arith.constant 0 : i32
    return %arg0, %c0_i32 : i32, i32
  }
}

</mosaic_0001>

<bundles_post_ra>
// kernel: abcnn_forward.1
= control target key start
LH: loop header
LB: loop body
LE: loop exit
PB: predicated region body
PF: predicated region fallthrough
CT: control target
= control target key end

     0   :  { %v12_v0 = vlaneseq  ;;  %v641_v5 = vmov 0   ;;  %s999_s0 = inlined_call_operand.vmem [shape: s32[8,16], index: 0, kind: input, shape index: {}]   ;;  %s1000_s1 = inlined_call_operand.vmem [shape: f32[128,2], index: 1, kind: input, shape index: {}]   ;;  %s1001_s2 = inlined_call_operand.vmem [shape: f32[8,2], index: 2, kind: output, shape index: {}]  }
   0x1   :  { %v11_v1 = vld [vmem:[%s999_s0] sm:$0xff]  ;;  %v241_v17 = vld [vmem:[%s1000_s1 + $0x78] sm:$0xff]  ;;  %v240_v19 = vld [vmem:[%s1000_s1 + $0x70] sm:$0xff] }
   0x2   :  { %v20_v2 = vshrl.u32 %v12_v0, 7  ;;  %v661_v3 = vand.u32 127, %v12_v0  ;;  %v14_v4 = vmul.u32 2, %v11_v1  ;;  %v667_v18 = vand.u32 4294901760, %v241_v17  ;;  %v239_v22 = vld [vmem:[%s1000_s1 + $0x68] sm:$0xff]  ;;  %v238_v26 = vld [vmem:[%s1000_s1 + $0x60] sm:$0xff] }
   0x3   :  { %v675_v21 = vand.u32 4294901760, %v240_v19  ;;  %v686_v25 = vand.u32 4294901760, %v239_v22  ;;  %v237_v30 = vld [vmem:[%s1000_s1 + $0x58] sm:$0xff]  ;;  %v707_v31 = vand.u32 4294901760, %v238_v26  ;;  %v236_v36 = vld [vmem:[%s1000_s1 + $0x50] sm:$0xff]  ;;  %v235_v45 = vld [vmem:[%s1000_s1 + $0x48] sm:$0xff] }
   0x4   :  { %631 = vset.pattern.permute.xlu1 %v20_v2  ;;  %630 = vset.pattern.permute.xlu0 %v20_v2  ;;  %vm15_vm0 = vcmp.ge.s32.totalorder %v661_v3, 8  ;;  %v27_v11 = vadd.s32 8, %v20_v2  ;;  %v673_v20 = vsub.f32 %v241_v17, %v667_v18  ;;  %v709_v32 = vand.u32 4294901760, %v237_v30  ;;  %v234_v47 = vld [vmem:[%s1000_s1 + $0x40] sm:$0xff]  ;;  %v233_v53 = vld [vmem:[%s1000_s1 + $0x38] sm:$0xff]  ;;  %v232_v60 = vld [vmem:[%s1000_s1 + $0x30] sm:$0xff] }
   0x5   :  { %v16_v6 = vsel %vm15_vm0, 1, %v641_v5  ;;  %632 = vset.pattern.permute.xlu2 %v20_v2  ;;  %266 = vmatpush.msra.mxu0 %v667_v18  ;;  %v684_v24 = vsub.f32 %v240_v19, %v675_v21  ;;  %v701_v29 = vsub.f32 %v239_v22, %v686_v25  ;;  %v720_v37 = vsub.f32 %v238_v26, %v707_v31 }
   0x6   :  { %v17_v7 = vadd.s32 %v16_v6, %v14_v4  ;;  %462 = vmatpush.msra.mxu3 %v667_v18  ;;  %v308_v23 = vand.u32 4294901760, %v673_v20  ;;  %409 = vmatpush.msra.mxu2 %v673_v20  ;;  %v723_v38 = vsub.f32 %v237_v30, %v709_v32  ;;  %v725_v39 = vand.u32 4294901760, %v236_v36 }
   0x7   :  { %268 = vmatpush.msra.mxu0 %v675_v21  ;;  %v314_v28 = vand.u32 4294901760, %v684_v24  ;;  %v320_v35 = vand.u32 4294901760, %v701_v29  ;;  %v326_v42 = vand.u32 4294901760, %v720_v37  ;;  %v755_v51 = vand.u32 4294901760, %v235_v45 }
   0x8   :  { %v31_v8 = vperm.slane %v17_v7, 1  ;;  %v18_v9 = vperm.slane %v17_v7, 0  ;;  %v44_v10 = vperm.slane %v17_v7, 2  ;;  %v70_v12 = vperm.slane %v17_v7, 4  ;;  %464 = vmatpush.msra.mxu3 %v675_v21  ;;  %412 = vmatpush.msra.mxu2 %v684_v24 }
   0x9   :  { %v57_v13 = vperm.slane %v17_v7, 3  ;;  %v96_v14 = vperm.slane %v17_v7, 6  ;;  %v83_v15 = vperm.slane %v17_v7, 5  ;;  %v109_v16 = vperm.slane %v17_v7, 7  ;;  %270 = vmatpush.msra.mxu0 %v686_v25 }
   0xa   :  { %v309_v27 = vsub.f32 %v673_v20, %v308_v23  ;;  %466 = vmatpush.msra.mxu3 %v686_v25  ;;  %v315_v34 = vsub.f32 %v684_v24, %v314_v28  ;;  %415 = vmatpush.msra.mxu2 %v701_v29  ;;  %v321_v41 = vsub.f32 %v701_v29, %v320_v35  ;;  %v332_v43 = vand.u32 4294901760, %v723_v38 }
   0xb   :  { %272 = vmatpush.msra.mxu0 %v707_v31  ;;  %v735_v44 = vsub.f32 %v236_v36, %v725_v39  ;;  %v327_v48 = vsub.f32 %v720_v37, %v326_v42  ;;  %v757_v52 = vand.u32 4294901760, %v234_v47  ;;  %v766_v57 = vand.u32 4294901760, %v233_v53 }
   0xc   :  { %36 = vperm.xlu1 %631, %v31_v8   ;;  %23 = vperm.xlu0 %630, %v18_v9   ;;  %v310_v33 = vand.u32 4294901760, %v309_v27  ;;  %v316_v40 = vand.u32 4294901760, %v315_v34  ;;  %v322_v46 = vand.u32 4294901760, %v321_v41  ;;  %v333_v49 = vsub.f32 %v723_v38, %v332_v43  ;;  %v228_v27 = vld [vmem:[%s1000_s1 + $0x10] sm:$0xff] }
   0xd   :  { %49 = vperm.xlu2 %632, %v44_v10   ;;  %468 = vmatpush.msra.mxu3 %v707_v31  ;;  %v338_v50 = vand.u32 4294901760, %v735_v44  ;;  %v328_v54 = vand.u32 4294901760, %v327_v48  ;;  %v770_v58 = vsub.f32 %v235_v45, %v755_v51  ;;  %v773_v59 = vsub.f32 %v234_v47, %v757_v52  ;;  %v227_v45 = vld [vmem:[%s1000_s1 + $0x8] sm:$0xff] }
   0xe   :  { %311 = vmatpush.msra.mxu1 %v310_v33  ;;  %274 = vmatpush.msra.mxu0 %v709_v32  ;;  %v334_v55 = vand.u32 4294901760, %v333_v49  ;;  %v781_v62 = vsub.f32 %v233_v53, %v766_v57  ;;  %v783_v63 = vand.u32 4294901760, %v232_v60  ;;  %v843_v36 = vand.u32 4294901760, %v228_v27 }
   0xf   :  { %418 = vmatpush.msra.mxu2 %v720_v37  ;;  %470 = vmatpush.msra.mxu3 %v709_v32  ;;  %v339_v56 = vsub.f32 %v735_v44, %v338_v50  ;;  %v344_v0 = vand.u32 4294901760, %v770_v58  ;;  %v350_v1 = vand.u32 4294901760, %v773_v59  ;;  %v863_v53 = vand.u32 4294901760, %v227_v45 }
  0x10   :  { %317 = vmatpush.msra.mxu1 %v316_v40  ;;  %276 = vmatpush.msra.mxu0 %v725_v39  ;;  %v356_v5 = vand.u32 4294901760, %v781_v62  ;;  %v796_v6 = vsub.f32 %v232_v60, %v783_v63  ;;  %v861_v49 = vsub.f32 %v228_v27, %v843_v36 }
  0x11   :  { %421 = vmatpush.msra.mxu2 %v723_v38  ;;  %472 = vmatpush.msra.mxu3 %v725_v39  ;;  %v340_v61 = vand.u32 4294901760, %v339_v56 }
  0x12   :  { %323 = vmatpush.msra.mxu1 %v322_v46  ;;  %278 = vmatpush.msra.mxu0 %v755_v51 }
  0x13   :  { %424 = vmatpush.msra.mxu2 %v735_v44  ;;  %474 = vmatpush.msra.mxu3 %v755_v51 }
  0x14   :  { %633 = vset.pattern.permute.xlu1 %v27_v11  ;;  %75 = vperm.xlu0 %630, %v70_v12  }
  0x15   :  { %635 = vset.pattern.permute.xlu2 %v27_v11  ;;  %329 = vmatpush.msra.mxu1 %v328_v54 }
  0x16   :  { %280 = vmatpush.msra.mxu0 %v757_v52  ;;  %427 = vmatpush.msra.mxu2 %v770_v58 }
  0x17   :  { %335 = vmatpush.msra.mxu1 %v334_v55  ;;  %476 = vmatpush.msra.mxu3 %v757_v52  ;;  %v226_v55 = vld [vmem:[%s1000_s1] sm:$0xff] }
  0x18   :  { %282 = vmatpush.msra.mxu0 %v766_v57  ;;  %430 = vmatpush.msra.mxu2 %v773_v59 }
  0x19   :  { %341 = vmatpush.msra.mxu1 %v340_v61  ;;  %478 = vmatpush.msra.mxu3 %v766_v57 }
  0x1a   :  { %284 = vmatpush.msra.mxu0 %v783_v63  ;;  %433 = vmatpush.msra.mxu2 %v781_v62 }
  0x1b   :  { %480 = vmatpush.msra.mxu3 %v783_v63 }
  0x1c   :  { %42 = vperm.xlu1 %633, %v31_v8   ;;  %636 = vset.pattern.permute.xlu0 %v27_v11  ;;  %v345_v8 = vsub.f32 %v770_v58, %v344_v0 }
  0x1d   :  { %55 = vperm.xlu2 %635, %v44_v10   ;;  %v230_v10 = vld [vmem:[%s1000_s1 + $0x20] sm:$0xff]  ;;  %436 = vmatpush.msra.mxu2 %v796_v6 }
  0x1e   :  { %v828_v19 = vand.u32 4294901760, %v230_v10 }
  0x20   :  { %v841_v34 = vsub.f32 %v230_v10, %v828_v19  ;;  %v885_v10 = vsub.f32 %v227_v45, %v863_v53 }
  0x22   :  { %v374_v48 = vand.u32 4294901760, %v841_v34 }
  0x24   :  { %634 = vset.pattern.permute.xlu1 %v20_v2  ;;  %29 = vperm.xlu0 %636, %v18_v9   ;;  %v351_v9 = vsub.f32 %v773_v59, %v350_v1  ;;  %v375_v61 = vsub.f32 %v841_v34, %v374_v48 }
  0x25   :  { %68 = vperm.xlu2 %635, %v57_v13  }
  0x2c   :  { %62 = vperm.xlu1 %634, %v57_v13   ;;  %107 = vperm.xlu0 %636, %v96_v14   ;;  %v346_v13 = vand.u32 4294901760, %v345_v8  ;;  %v376_v8 = vand.u32 4294901760, %v375_v61 }
  0x2d   :  { %638 = vset.pattern.permute.xlu2 %v20_v2 }
  0x2e   :  { %347 = vmatpush.msra.mxu1 %v346_v13 }
  0x34   :  { %637 = vset.pattern.permute.xlu1 %v27_v11 }
  0x35   :  { %88 = vperm.xlu2 %638, %v83_v15  }
  0x3c   :  { %81 = vperm.xlu1 %637, %v70_v12   ;;  %v362_v12 = vand.u32 4294901760, %v796_v6 }
  0x3d   :  { %101 = vperm.xlu2 %638, %v96_v14   ;;  %v352_v14 = vand.u32 4294901760, %v351_v9  ;;  %v386_v9 = vand.u32 4294901760, %v861_v49 }
  0x3f   :  { %353 = vmatpush.msra.mxu1 %v352_v14  ;;  %v387_v14 = vsub.f32 %v861_v49, %v386_v9 }
  0x44   :  { %94 = vperm.xlu1 %637, %v83_v15   ;;  %v229_v15 = vld [vmem:[%s1000_s1 + $0x18] sm:$0xff] }
  0x45   :  { %640 = vset.pattern.permute.xlu2 %v27_v11  ;;  %v357_v11 = vsub.f32 %v781_v62, %v356_v5  ;;  %v831_v26 = vand.u32 4294901760, %v229_v15 }
  0x47   :  { %v358_v22 = vand.u32 4294901760, %v357_v11  ;;  %v848_v41 = vsub.f32 %v229_v15, %v831_v26  ;;  %v887_v11 = vand.u32 4294901760, %v226_v55  ;;  %v392_v15 = vand.u32 4294901760, %v885_v10 }
  0x49   :  { %359 = vmatpush.msra.mxu1 %v358_v22  ;;  %v380_v54 = vand.u32 4294901760, %v848_v41  ;;  %v393_v45 = vsub.f32 %v885_v10, %v392_v15 }
  0x4c   :  { %639 = vset.pattern.permute.xlu1 %v20_v2  ;;  %v231_v2 = vld [vmem:[%s1000_s1 + $0x28] sm:$0xff] }
  0x4d   :  { %120 = vperm.xlu2 %640, %v109_v16   ;;  %v798_v7 = vand.u32 4294901760, %v231_v2 }
  0x4f   :  { %v826_v17 = vsub.f32 %v231_v2, %v798_v7  ;;  %286 = vmatpush.msra.mxu0 %v798_v7  ;;  %482 = vmatpush.msra.mxu3 %v798_v7  ;;  %v381_v2 = vsub.f32 %v848_v41, %v380_v54 }
  0x51   :  { %v368_v33 = vand.u32 4294901760, %v826_v17  ;;  %288 = vmatpush.msra.mxu0 %v828_v19  ;;  %439 = vmatpush.msra.mxu2 %v826_v17  ;;  %v382_v13 = vand.u32 4294901760, %v381_v2 }
  0x52   :  { %484 = vmatpush.msra.mxu3 %v828_v19 }
  0x53   :  { %v369_v47 = vsub.f32 %v826_v17, %v368_v33  ;;  %290 = vmatpush.msra.mxu0 %v831_v26  ;;  %442 = vmatpush.msra.mxu2 %v841_v34 }
  0x54   :  { %114 = vperm.xlu1 %639, %v109_v16   ;;  %v363_v16 = vsub.f32 %v796_v6, %v362_v12  ;;  %486 = vmatpush.msra.mxu3 %v831_v26 }
  0x55   :  { %v370_v60 = vand.u32 4294901760, %v369_v47  ;;  %292 = vmatpush.msra.mxu0 %v843_v36  ;;  %445 = vmatpush.msra.mxu2 %v848_v41 }
  0x56   :  { %v364_v40 = vand.u32 4294901760, %v363_v16  ;;  %488 = vmatpush.msra.mxu3 %v843_v36  ;;  %v897_v16 = vsub.f32 %v226_v55, %v887_v11 }
  0x57   :  { %294 = vmatpush.msra.mxu0 %v863_v53  ;;  %448 = vmatpush.msra.mxu2 %v861_v49 }
  0x58   :  { %365 = vmatpush.msra.mxu1 %v364_v40  ;;  %490 = vmatpush.msra.mxu3 %v863_v53  ;;  %v388_v40 = vand.u32 4294901760, %v387_v14  ;;  %v398_v47 = vand.u32 4294901760, %v897_v16 }
  0x59   :  { %296 = vmatpush.msra.mxu0 %v887_v11  ;;  %451 = vmatpush.msra.mxu2 %v885_v10 }
  0x5a   :  { %371 = vmatpush.msra.mxu1 %v370_v60  ;;  %492 = vmatpush.msra.mxu3 %v887_v11  ;;  %v394_v60 = vand.u32 4294901760, %v393_v45  ;;  %v399_v61 = vsub.f32 %v897_v16, %v398_v47 }
  0x5b   :  { %503 = vmatpush.msrb.mxu0 %v308_v23  ;;  %454 = vmatpush.msra.mxu2 %v897_v16 }
  0x5c   :  { %377 = vmatpush.msra.mxu1 %v376_v8  ;;  %v400_v2 = vand.u32 4294901760, %v399_v61 }
  0x5d   :  { %507 = vmatpush.msrb.mxu0 %v314_v28 }
  0x5e   :  { %383 = vmatpush.msra.mxu1 %v382_v13 }
  0x5f   :  { %511 = vmatpush.msrb.mxu0 %v320_v35 }
  0x60   :  { %389 = vmatpush.msra.mxu1 %v388_v40 }
  0x61   :  { %515 = vmatpush.msrb.mxu0 %v326_v42 }
  0x62   :  { %395 = vmatpush.msra.mxu1 %v394_v60 }
  0x63   :  { %519 = vmatpush.msrb.mxu0 %v332_v43 }
  0x64   :  { %401 = vmatpush.msra.mxu1 %v400_v2 }
  0x65   :  { %523 = vmatpush.msrb.mxu0 %v338_v50 }
  0x66   :  { %570 = vmatpush.msrb.mxu1 %v667_v18  ;;  %v642_v18 = vmov 0.0  }
  0x67   :  { %v792_v4 = vpop.permute.xlu2 %49  ;;  %527 = vmatpush.msrb.mxu0 %v344_v0 }
  0x68   :  { %572 = vmatpush.msrb.mxu1 %v675_v21  ;;  %vm126_vm6 = vcmp.eq.s32.totalorder %v792_v4, %v661_v3 }
  0x69   :  { %531 = vmatpush.msrb.mxu0 %v350_v1  ;;  %v616_v38 = vsel %vm126_vm6, 1.0, %v642_v18  ;;  %vm260_vm6 = vcmask 1046534  }
  0x6a   :  { %574 = vmatpush.msrb.mxu1 %v686_v25 }
  0x6b   :  { %535 = vmatpush.msrb.mxu0 %v356_v5 }
  0x6c   :  { %576 = vmatpush.msrb.mxu1 %v707_v31 }
  0x6d   :  { %539 = vmatpush.msrb.mxu0 %v362_v12 }
  0x6e   :  { %578 = vmatpush.msrb.mxu1 %v709_v32 }
  0x6f   :  { %543 = vmatpush.msrb.mxu0 %v368_v33 }
  0x70   :  { %580 = vmatpush.msrb.mxu1 %v725_v39 }
  0x71   :  { %547 = vmatpush.msrb.mxu0 %v374_v48 }
  0x72   :  { %582 = vmatpush.msrb.mxu1 %v755_v51 }
  0x73   :  { %551 = vmatpush.msrb.mxu0 %v380_v54 }
  0x74   :  { %584 = vmatpush.msrb.mxu1 %v757_v52 }
  0x75   :  { %555 = vmatpush.msrb.mxu0 %v386_v9 }
  0x76   :  { %586 = vmatpush.msrb.mxu1 %v766_v57 }
  0x77   :  { %v872_v56 = vpop.permute.xlu2 %55  ;;  %559 = vmatpush.msrb.mxu0 %v392_v15 }
  0x78   :  { %vm127_vm7 = vcmp.eq.s32.totalorder %v872_v56, %v661_v3  ;;  %588 = vmatpush.msrb.mxu1 %v783_v63 }
  0x79   :  { %v617_v39 = vsel %vm127_vm7, 1.0, %v642_v18  ;;  %563 = vmatpush.msrb.mxu0 %v398_v47  ;;  %vm262_vm7 = vcmask 1047559  }
  0x7a   :  { %v184_v62 = vadd.f32 %v617_v39, %v616_v38  ;;  %590 = vmatpush.msrb.mxu1 %v798_v7 }
  0x7c   :  { %v185_v33 = vrot.slane %v184_v62, 4  ;;  %592 = vmatpush.msrb.mxu1 %v828_v19 }
  0x7e   :  { %v837_v30 = vpop.permute.xlu0 %23  ;;  %v854_v46 = vpop.permute.xlu1 %36  ;;  %v186_v54 = vadd.f32 %v185_v33, %v184_v62  ;;  %594 = vmatpush.msrb.mxu1 %v831_v26 }
  0x7f   :  { %v69_v55 = vpop.permute.xlu2 %68  ;;  %vm122_vm1 = vcmp.eq.s32.totalorder %v837_v30, %v661_v3  ;;  %vm124_vm4 = vcmp.eq.s32.totalorder %v854_v46, %v661_v3 }
  0x80   :  { %v612_v21 = vsel %vm122_vm1, 1.0, %v642_v18  ;;  %vm129_vm10 = vcmp.eq.s32.totalorder %v69_v55, %v661_v3  ;;  %v614_v32 = vsel %vm124_vm4, 1.0, %v642_v18  ;;  %596 = vmatpush.msrb.mxu1 %v843_v36  ;;  %v187_v15 = vrot.slane %v186_v54, 2 }
  0x81   :  { %v619_v58 = vsel %vm129_vm10, 1.0, %v642_v18  ;;  %vm250_vm1 = vcmask 1041409   ;;  %vm256_vm4 = vcmask 1044484  }
  0x82   :  { %598 = vmatpush.msrb.mxu1 %v863_v53  ;;  %v188_v45 = vadd.f32 %v187_v15, %v186_v54 }
  0x84   :  { %600 = vmatpush.msrb.mxu1 %v887_v11 }
  0x86   :  { %v76_v27 = vpop.permute.xlu0 %75 }
  0x87   :  { %vm130_vm9 = vcmp.eq.s32.totalorder %v76_v27, %v661_v3 }
  0x88   :  { %v620_v50 = vsel %vm130_vm9, 1.0, %v642_v18 }
  0x8e   :  { %v43_v22 = vpop.permute.xlu1 %42 }
  0x8f   :  { %v89_v24 = vpop.permute.xlu2 %88  ;;  %vm125_vm3 = vcmp.eq.s32.totalorder %v43_v22, %v661_v3 }
  0x90   :  { %v615_v29 = vsel %vm125_vm3, 1.0, %v642_v18  ;;  %vm132_vm11 = vcmp.eq.s32.totalorder %v89_v24, %v661_v3  ;;  %vm254_vm3 = vcmask 1043459  }
  0x91   :  { %v177_v42 = vadd.f32 %v615_v29, %v614_v32  ;;  %v622_v4 = vsel %vm132_vm11, 1.0, %v642_v18 }
  0x93   :  { %v178_v52 = vrot.slane %v177_v42, 4 }
  0x95   :  { %v179_v41 = vadd.f32 %v178_v52, %v177_v42 }
  0x96   :  { %v30_v23 = vpop.permute.xlu0 %29 }
  0x97   :  { %vm123_vm2 = vcmp.eq.s32.totalorder %v30_v23, %v661_v3  ;;  %v102_v37 = vpop.permute.xlu2 %101  ;;  %v180_v8 = vrot.slane %v179_v41, 2 }
  0x98   :  { %v613_v25 = vsel %vm123_vm2, 1.0, %v642_v18  ;;  %vm134_vm12 = vcmp.eq.s32.totalorder %v102_v37, %v661_v3  ;;  %vm252_vm2 = vcmask 1042434  }
  0x99   :  { %v170_v31 = vadd.f32 %v613_v25, %v612_v21  ;;  %v624_v5 = vsel %vm134_vm12, 1.0, %v642_v18  ;;  %v181_v19 = vadd.f32 %v180_v8, %v179_v41  ;;  %v189_v21 = vrot.slane %v188_v45, 1 }
  0x9b   :  { %v171_v51 = vrot.slane %v170_v31, 4  ;;  %v182_v60 = vrot.slane %v181_v19, 1  ;;  %v190_v38 = vadd.f32 %v189_v21, %v188_v45 }
  0x9d   :  { %v172_v12 = vadd.f32 %v171_v51, %v170_v31  ;;  %v183_v25 = vadd.f32 %v182_v60, %v181_v19 }
  0x9e   :  { %v63_v20 = vpop.permute.xlu1 %62  ;;  %v108_v43 = vpop.permute.xlu0 %107 }
  0x9f   :  { %vm128_vm5 = vcmp.eq.s32.totalorder %v63_v20, %v661_v3  ;;  %vm135_vm13 = vcmp.eq.s32.totalorder %v108_v43, %v661_v3  ;;  %v173_v63 = vrot.slane %v172_v12, 2 }
  0xa0   :  { %v618_v35 = vsel %vm128_vm5, 1.0, %v642_v18  ;;  %v625_v57 = vsel %vm135_vm13, 1.0, %v642_v18  ;;  %vm258_vm5 = vcmask 1045509  }
  0xa1   :  { %v191_v59 = vadd.f32 %v619_v58, %v618_v35  ;;  %v212_v48 = vadd.f32 %v625_v57, %v624_v5  ;;  %v174_v10 = vadd.f32 %v173_v63, %v172_v12 }
  0xa3   :  { %v192_v17 = vrot.slane %v191_v59, 4  ;;  %v213_v7 = vrot.slane %v212_v48, 4  ;;  %v175_v26 = vrot.slane %v174_v10, 1 }
  0xa5   :  { %v193_v49 = vadd.f32 %v192_v17, %v191_v59  ;;  %v214_v27 = vadd.f32 %v213_v7, %v212_v48  ;;  %v176_v20 = vadd.f32 %v175_v26, %v174_v10 }
  0xa7   :  { %v121_v13 = vpop.permute.xlu2 %120  ;;  %v194_v14 = vrot.slane %v193_v49, 2  ;;  %v215_v2 = vrot.slane %v214_v27, 2  ;;  %v251_v32 = vsel %vm250_vm1, %v183_v25, %v176_v20 }
  0xa8   :  { %vm137_vm15 = vcmp.eq.s32.totalorder %v121_v13, %v661_v3  ;;  %v253_v42 = vsel %vm252_vm2, %v190_v38, %v251_v32 }
  0xa9   :  { %v195_v40 = vadd.f32 %v194_v14, %v193_v49  ;;  %v627_v55 = vsel %vm137_vm15, 1.0, %v642_v18  ;;  %v216_v31 = vadd.f32 %v215_v2, %v214_v27 }
  0xab   :  { %v196_v23 = vrot.slane %v195_v40, 1  ;;  %v217_v43 = vrot.slane %v216_v31, 1 }
  0xad   :  { %v197_v35 = vadd.f32 %v196_v23, %v195_v40  ;;  %v218_v62 = vadd.f32 %v217_v43, %v216_v31 }
  0xae   :  { %v82_v28 = vpop.permute.xlu1 %81 }
  0xaf   :  { %vm131_vm8 = vcmp.eq.s32.totalorder %v82_v28, %v661_v3 }
  0xb0   :  { %v621_v44 = vsel %vm131_vm8, 1.0, %v642_v18  ;;  %vm606_vm8 = vcmask 15360  }
  0xb1   :  { %v198_v0 = vadd.f32 %v621_v44, %v620_v50  ;;  %v255_v44 = vsel %vm254_vm3, %v197_v35, %v253_v42 }
  0xb3   :  { %v199_v34 = vrot.slane %v198_v0, 4 }
  0xb5   :  { %v200_v56 = vadd.f32 %v199_v34, %v198_v0 }
  0xb6   :  { %v95_v1 = vpop.permute.xlu1 %94 }
  0xb7   :  { %vm133_vm14 = vcmp.eq.s32.totalorder %v95_v1, %v661_v3  ;;  %v201_v22 = vrot.slane %v200_v56, 2 }
  0xb8   :  { %v623_v6 = vsel %vm133_vm14, 1.0, %v642_v18 }
  0xb9   :  { %v205_v30 = vadd.f32 %v623_v6, %v622_v4  ;;  %v202_v47 = vadd.f32 %v201_v22, %v200_v56 }
  0xbb   :  { %v206_v46 = vrot.slane %v205_v30, 4  ;;  %v203_v11 = vrot.slane %v202_v47, 1 }
  0xbd   :  { %v207_v9 = vadd.f32 %v206_v46, %v205_v30 }
  0xbf   :  { %v208_v16 = vrot.slane %v207_v9, 2 }
  0xc1   :  { %v209_v61 = vadd.f32 %v208_v16, %v207_v9 }
  0xc3   :  { %v210_v28 = vrot.slane %v209_v61, 1 }
  0xc5   :  { %v211_v39 = vadd.f32 %v210_v28, %v209_v61 }
  0xc6   :  { %v115_v36 = vpop.permute.xlu1 %114 }
  0xc7   :  { %vm136_vm0 = vcmp.eq.s32.totalorder %v115_v36, %v661_v3  ;;  %v204_v3 = vadd.f32 %v203_v11, %v202_v47 }
  0xc8   :  { %v626_v53 = vsel %vm136_vm0, 1.0, %v642_v18 }
  0xc9   :  { %v219_v24 = vadd.f32 %v627_v55, %v626_v53  ;;  %v257_v58 = vsel %vm256_vm4, %v204_v3, %v255_v44 }
  0xca   :  { %v259_v59 = vsel %vm258_vm5, %v211_v39, %v257_v58 }
  0xcb   :  { %v220_v29 = vrot.slane %v219_v24, 4  ;;  %v261_v1 = vsel %vm260_vm6, %v218_v62, %v259_v59 }
  0xcd   :  { %v221_v37 = vadd.f32 %v220_v29, %v219_v24 }
  0xcf   :  { %v222_v18 = vrot.slane %v221_v37, 2 }
  0xd1   :  { %v223_v50 = vadd.f32 %v222_v18, %v221_v37 }
  0xd3   :  { %v224_v51 = vrot.slane %v223_v50, 1 }
  0xd5   :  { %v225_v0 = vadd.f32 %v224_v51, %v223_v50 }
  0xd7   :  { %v263_v52 = vsel %vm262_vm7, %v225_v0, %v261_v1 }
  0xd8   :  { %v297_v4 = vand.u32 4294901760, %v263_v52 }
  0xda   :  { %403 = vmatmul.f32.vlgmr.msra.gmra.mxu1 %v297_v4  ;;  %v298_v5 = vsub.f32 %v263_v52, %v297_v4 }
  0xdc   :  { %457 = vmatmul.f32.vlgmr.msra.gmra.mxu2 %v298_v5  ;;  %v299_v6 = vand.u32 4294901760, %v298_v5 }
  0xde   :  { %496 = vmatmul.f32.vlgmr.msra.gmra.mxu3 %v299_v6  ;;  %v300_v12 = vsub.f32 %v298_v5, %v299_v6 }
  0xe0   :  { %v301_v17 = vand.u32 4294901760, %v300_v12 }
  0xe2   :  { %302 = vmatmul.f32.vlgmr.msra.gmra.mxu0 %v301_v17  ;;  %602 = vmatmul.f32.vlgmr.msrb.gmra.mxu1 %v297_v4 }
  0xea   :  { %565 = vmatmul.f32.vlgmr.msrb.gmra.mxu0 %v297_v4 }
 0x157   :  { %v404_v57 = vpop.f32.mrf.mxu1 }
 0x15f   :  { %v303_v30 = vpop.f32.mrf.mxu0  ;;  %v458_v34 = vpop.f32.mrf.mxu2 }
 0x160   :  { %v405_v33 = vadd.f32 %v404_v57, %v303_v30  ;;  %v603_v54 = vpop.f32.mrf.mxu1 }
 0x161   :  { %v497_v46 = vpop.f32.mrf.mxu3 }
 0x162   :  { %v459_v41 = vadd.f32 %v458_v34, %v405_v33 }
 0x164   :  { %v498_v48 = vadd.f32 %v497_v46, %v459_v41 }
 0x167   :  { %v566_v63 = vpop.f32.mrf.mxu0 }
 0x168   :  { %v567_v49 = vadd.f32 %v566_v63, %v498_v48 }
 0x16a   :  { %v604_v56 = vadd.f32 %v603_v54, %v567_v49 }
 0x16c   :  { %607 = vst.msk [vmem:[%s1001_s2] sm:$0xff] %vm606_vm8, %v604_v56 }

</bundles_post_ra>
